<compile_context>
chip_gen: v7x
topology: tpu7x:2x2x1
jax: 0.10.0
libtpu: 0.0.40
codegen_flags: <defaults>
</compile_context>

<pallas_src>
import jax
import jax.numpy as jnp
from jax.experimental import pallas as pl
from jax.experimental.pallas import tpu as pltpu


def attention_head_kernel(x_ref, wqkv_ref, o_ref):
    # x_ref:    (Bb*T, C)   bf16   flattened batch-block of activations
    # wqkv_ref: (C, 3*Dp)   bf16   stacked, zero-padded Wq|Wk|Wv
    # o_ref:    (Bb, T, Dh) f32    compact (un-padded) output block
    _, C = x_ref.shape
    Bb, T, Dh = o_ref.shape
    Dp = wqkv_ref.shape[1] // 3
    scale = C ** (-0.5)  # PyTorch module scales by C**-0.5 (num_embed), not head_size**-0.5

    # ---- fused QKV projection (batch folded into the MXU M dimension) ----
    qkv = jnp.dot(x_ref[...], wqkv_ref[...],
                  preferred_element_type=jnp.float32)          # (Bb*T, 3*Dp)
    # Lane dim unchanged and T is a sublane-tile multiple -> cheap reshape.
    qkv = qkv.reshape(Bb, T, 3 * Dp)
    q = qkv[:, :, 0 * Dp:1 * Dp].astype(jnp.bfloat16)          # (Bb, T, Dp)
    k = qkv[:, :, 1 * Dp:2 * Dp].astype(jnp.bfloat16)          # (Bb, T, Dp)
    v = qkv[:, :, 2 * Dp:2 * Dp + Dh].astype(jnp.bfloat16)     # (Bb, T, Dh) live lanes only

    # ---- scores + in-kernel additive causal mask (0 on/below diag, -1e30 above) ----
    wei = jnp.einsum("bqd,bkd->bqk", q, k,
                     preferred_element_type=jnp.float32) * scale
    row = jax.lax.broadcasted_iota(jnp.int32, (T, T), 0)
    col = jax.lax.broadcasted_iota(jnp.int32, (T, T), 1)
    mask = jnp.where(row >= col, 0.0, -1e30).astype(jnp.float32)
    wei = wei + mask[None, :, :]

    # ---- softmax in f32; exp + reciprocal run on the EUP ----
    m = jnp.max(wei, axis=-1, keepdims=True)
    e = jnp.exp(wei - m)
    p = e * pl.reciprocal(jnp.sum(e, axis=-1, keepdims=True), approx=True)

    # TODO(synk): attention-weight dropout is identity (inference / p=0).
    out = jnp.einsum("bqk,bkd->bqd", p.astype(jnp.bfloat16), v,
                     preferred_element_type=jnp.float32)       # (Bb, T, Dh)
    o_ref[...] = out.astype(o_ref.dtype)


def attention_head(x, wq, wk, wv, *, block_batch=None):
    B, T, C = x.shape
    Dh = wq.shape[1]
    Dp = ((Dh + 127) // 128) * 128   # pad head dim to a 128-lane multiple for the MXU
    # NOTE: Dp is the minimal 128-multiple of the real head size; re-derive the
    # padding tradeoff when Dh grows (wasted MXU columns become real pushes).

    if block_batch is None:
        # Single grid step by default (1 TC on v5e/v6e; grid = serial loop).
        # Split in two for v7x's megacore only when each half-step still has a
        # large, overhead-amortizing projection slab.
        if B % 2 == 0 and (B // 2) * T >= 2048:
            block_batch = B // 2
        else:
            block_batch = B
    Bb = block_batch
    assert B % Bb == 0
    grid = (B // Bb,)

    # Wrapper-side flatten + bf16 cast of x (free, row-major; halves x DMA bytes).
    x2d = x.reshape(B * T, C).astype(jnp.bfloat16)

    # Stack & zero-pad Wq|Wk|Wv into one lane-dense bf16 (C, 3*Dp) operand.
    # Zero padding is exact: padded q/k lanes contribute 0 to q@k^T and padded
    # v lanes are never read (kernel slices the Dh live lanes).
    def pad(w):
        return jnp.pad(w, ((0, 0), (0, Dp - Dh)))
    wqkv = jnp.concatenate([pad(wq), pad(wk), pad(wv)], axis=1).astype(jnp.bfloat16)

    # Scoped-VMEM limit: resident blocks (double-buffered) + f32/bf16
    # intermediates + headroom, capped at 48 MiB (leave v7x compiler scratch).
    resident = (Bb * T * C * 2           # x block (bf16)
                + C * 3 * Dp * 2         # fused weights (bf16)
                + Bb * T * Dh * 4)       # output block (f32)
    intermediates = (Bb * T * 3 * Dp * 4     # qkv f32
                     + Bb * T * 3 * Dp * 2   # q/k/v bf16
                     + 2 * Bb * T * T * 4    # scores + probs f32
                     + Bb * T * Dp * 4)      # PV accumulation f32
    vmem_limit = int(min(max(2 * resident + intermediates + (8 << 20), 16 << 20),
                         48 << 20))

    out = pl.pallas_call(
        attention_head_kernel,
        out_shape=jax.ShapeDtypeStruct((B, T, Dh), x.dtype),
        grid_spec=pltpu.PrefetchScalarGridSpec(
            num_scalar_prefetch=0,
            grid=grid,
            in_specs=[
                pl.BlockSpec((Bb * T, C), lambda b: (b, 0)),     # x slab (batch-blocked)
                pl.BlockSpec((C, 3 * Dp), lambda b: (0, 0)),     # fused Wqkv (constant)
            ],
            out_specs=pl.BlockSpec((Bb, T, Dh), lambda b: (b, 0, 0)),
        ),
        compiler_params=pltpu.CompilerParams(
            dimension_semantics=("parallel",),
            vmem_limit_bytes=vmem_limit,
        ),
    )(x2d, wqkv)

    return out


def attention_head_ref(x, wq, wk, wv):
    """Pure-JAX f32 reference matching the PyTorch forward (dropout = identity)."""
    B, T, C = x.shape
    q = x @ wq
    k = x @ wk
    v = x @ wv
    wei = jnp.einsum("bqd,bkd->bqk", q, k) * (C ** (-0.5))
    tril = jnp.tril(jnp.ones((T, T), dtype=bool))
    wei = jnp.where(tril, wei, -jnp.inf)
    wei = jax.nn.softmax(wei, axis=-1)
    return jnp.einsum("bqk,bkd->bqd", wei, v)


if __name__ == "__main__":
    # Small shapes: B=8, T=block_size=16, C=num_embed=32, head_size=8.
    B, T, C, Dh = 8, 16, 32, 8

    key = jax.random.PRNGKey(0)
    kx, kq, kk, kv = jax.random.split(key, 4)
    x = jax.random.normal(kx, (B, T, C), jnp.float32)
    s = C ** (-0.5)
    wq = s * jax.random.normal(kq, (C, Dh), jnp.float32)
    wk = s * jax.random.normal(kk, (C, Dh), jnp.float32)
    wv = s * jax.random.normal(kv, (C, Dh), jnp.float32)

    out = attention_head(x, wq, wk, wv)   # default: Bb=B=8, single grid step
    out = jax.block_until_ready(out)

    ref = attention_head_ref(x, wq, wk, wv)
    assert out.shape == (B, T, Dh)
    assert bool(jnp.all(jnp.isfinite(out)))
    max_err = float(jnp.max(jnp.abs(out - ref)))
    # bf16 MXU operands (f32 accumulation) + approx reciprocal -> abs err ~1e-2.
    assert jnp.allclose(out, ref, rtol=5e-2, atol=5e-2), max_err

    print("KERNEL_OK")
</pallas_src>

<mosaic_0001>
module attributes {stable_mosaic.version = 11 : i64} {
  func.func @attention_head_kernel(%arg0: i32, %arg1: memref<128x32xbf16, #tpu.memory_space<vmem>>, %arg2: memref<32x384xbf16, #tpu.memory_space<vmem>>, %arg3: memref<8x16x8xf32, #tpu.memory_space<vmem>>) attributes {dimension_semantics = [#tpu.dimension_semantics<parallel>], iteration_bounds = array<i64: 1>, scalar_prefetch = 0 : i64, scratch_operands = 0 : i64, tpu.core_type = #tpu.core_type<tc>, window_params = [{transform_indices = @transform_0, window_bounds = array<i64: 128, 32>}, {pipeline_mode = #tpu.pipeline_mode<synchronous>, transform_indices = @transform_1, window_bounds = array<i64: 32, 384>}, {transform_indices = @transform_2, window_bounds = array<i64: 8, 16, 8>}]} {
    %c0 = arith.constant 0 : index
    %c0_0 = arith.constant 0 : index
    %0 = vector.load %arg1[%c0, %c0_0] : memref<128x32xbf16, #tpu.memory_space<vmem>>, vector<128x32xbf16>
    %c0_1 = arith.constant 0 : index
    %c0_2 = arith.constant 0 : index
    %1 = vector.load %arg2[%c0_1, %c0_2] : memref<32x384xbf16, #tpu.memory_space<vmem>>, vector<32x384xbf16>
    %cst = arith.constant dense<0.000000e+00> : vector<128x384xf32>
    %2 = tpu.matmul %0, %1, %cst {dimension_numbers = #tpu.dot_dimension_numbers<[1], [0], [0], [1], [0, 0, 1, 1], [], []>} : vector<128x32xbf16>, vector<32x384xbf16>, vector<128x384xf32> -> vector<128x384xf32>
    %3 = vector.shape_cast %2 : vector<128x384xf32> to vector<8x16x384xf32>
    %4 = vector.extract_strided_slice %3 {offsets = [0, 0, 0], sizes = [8, 16, 128], strides = [1, 1, 1]} : vector<8x16x384xf32> to vector<8x16x128xf32>
    %5 = arith.truncf %4 : vector<8x16x128xf32> to vector<8x16x128xbf16>
    %6 = vector.extract_strided_slice %3 {offsets = [0, 0, 128], sizes = [8, 16, 128], strides = [1, 1, 1]} : vector<8x16x384xf32> to vector<8x16x128xf32>
    %7 = arith.truncf %6 : vector<8x16x128xf32> to vector<8x16x128xbf16>
    %8 = vector.extract_strided_slice %3 {offsets = [0, 0, 256], sizes = [8, 16, 8], strides = [1, 1, 1]} : vector<8x16x384xf32> to vector<8x16x8xf32>
    %9 = arith.truncf %8 : vector<8x16x8xf32> to vector<8x16x8xbf16>
    "tpu.trace_start"() <{level = 10 : i32, message = "bqd,bkd->bqk"}> : () -> ()
    %cst_3 = arith.constant dense<0.000000e+00> : vector<8x16x16xf32>
    %10 = tpu.matmul %5, %7, %cst_3 {dimension_numbers = #tpu.dot_dimension_numbers<[2], [2], [1], [1], [0, 0, 0, 1, 1, 1], [0], [0]>} : vector<8x16x128xbf16>, vector<8x16x128xbf16>, vector<8x16x16xf32> -> vector<8x16x16xf32>
    "tpu.trace_stop"() : () -> ()
    %cst_4 = arith.constant 0.176776692 : f32
    %11 = vector.broadcast %cst_4 : f32 to vector<8x16x16xf32>
    %12 = arith.mulf %10, %11 : vector<8x16x16xf32>
    %13 = tpu.iota {dimensions = array<i32: 0>} : vector<16x16xi32>
    %14 = tpu.iota {dimensions = array<i32: 1>} : vector<16x16xi32>
    %15 = arith.cmpi sge, %13, %14 : vector<16x16xi32>
    %cst_5 = arith.constant 0.000000e+00 : f32
    %cst_6 = arith.constant -1.000000e+30 : f32
    %16 = vector.broadcast %cst_5 : f32 to vector<16x16xf32>
    %17 = vector.broadcast %cst_6 : f32 to vector<16x16xf32>
    %18 = arith.select %15, %16, %17 : vector<16x16xi1>, vector<16x16xf32>
    %19 = vector.shape_cast %18 : vector<16x16xf32> to vector<1x16x16xf32>
    %20 = vector.broadcast %19 : vector<1x16x16xf32> to vector<8x16x16xf32>
    %21 = arith.addf %12, %20 : vector<8x16x16xf32>
    %cst_7 = arith.constant dense<0xFF800000> : vector<8x16xf32>
    %22 = vector.multi_reduction <maximumf>, %21, %cst_7 [2] : vector<8x16x16xf32> to vector<8x16xf32>
    %23 = vector.shape_cast %22 : vector<8x16xf32> to vector<8x16x1xf32>
    %24 = vector.broadcast %23 : vector<8x16x1xf32> to vector<8x16x16xf32>
    %25 = arith.subf %21, %24 : vector<8x16x16xf32>
    %26 = math.exp %25 : vector<8x16x16xf32>
    %cst_8 = arith.constant dense<0.000000e+00> : vector<8x16xf32>
    %27 = vector.multi_reduction <add>, %26, %cst_8 [2] : vector<8x16x16xf32> to vector<8x16xf32>
    %28 = vector.shape_cast %27 : vector<8x16xf32> to vector<8x16x1xf32>
    %29 = tpu.reciprocal %28 {approx = true} : vector<8x16x1xf32> -> vector<8x16x1xf32>
    %30 = vector.broadcast %29 : vector<8x16x1xf32> to vector<8x16x16xf32>
    %31 = arith.mulf %26, %30 : vector<8x16x16xf32>
    %32 = arith.truncf %31 : vector<8x16x16xf32> to vector<8x16x16xbf16>
    "tpu.trace_start"() <{level = 10 : i32, message = "bqk,bkd->bqd"}> : () -> ()
    %cst_9 = arith.constant dense<0.000000e+00> : vector<8x16x8xf32>
    %33 = tpu.matmul %32, %9, %cst_9 {dimension_numbers = #tpu.dot_dimension_numbers<[2], [1], [1], [2], [0, 0, 0, 1, 1, 2], [0], [0]>} : vector<8x16x16xbf16>, vector<8x16x8xbf16>, vector<8x16x8xf32> -> vector<8x16x8xf32>
    "tpu.trace_stop"() : () -> ()
    %c0_10 = arith.constant 0 : index
    %c0_11 = arith.constant 0 : index
    %c0_12 = arith.constant 0 : index
    %34 = vector.load %arg3[%c0_10, %c0_11, %c0_12] : memref<8x16x8xf32, #tpu.memory_space<vmem>>, vector<8x16x8xf32>
    tpu.vector_store %arg3[%c0_10, %c0_11, %c0_12], %33 {strides = array<i32>} : memref<8x16x8xf32, #tpu.memory_space<vmem>>, vector<8x16x8xf32>,
    return
  }
  func.func @transform_0(%arg0: i32) -> (i32, i32) {
    %c0_i32 = arith.constant 0 : i32
    %c0_i32_0 = arith.constant 0 : i32
    return %arg0, %c0_i32 : i32, i32
  }
  func.func @transform_1(%arg0: i32) -> (i32, i32) {
    %c0_i32 = arith.constant 0 : i32
    %c0_i32_0 = arith.constant 0 : i32
    %c0_i32_1 = arith.constant 0 : i32
    return %c0_i32, %c0_i32_0 : i32, i32
  }
  func.func @transform_2(%arg0: i32) -> (i32, i32, i32) {
    %c0_i32 = arith.constant 0 : i32
    %c0_i32_0 = arith.constant 0 : i32
    %c0_i32_1 = arith.constant 0 : i32
    return %arg0, %c0_i32, %c0_i32_0 : i32, i32, i32
  }
}

</mosaic_0001>

<bundles_post_ra>
// kernel: tpu_custom_call.1
= control target key start
LH: loop header
LB: loop body
LE: loop exit
PB: predicated region body
PF: predicated region fallthrough
CT: control target
= control target key end

     0   :  { %v1574_v1 = vmov 0   ;;  %vm108_vm0 = vcmask 261120   ;;  %v1575_v15 = vmov 0.0   ;;  %vm1576_vm1 = vmmov 0   ;;  %s2023_s1 = inlined_call_operand.vmem [shape: bf16[32,384], index: 1, kind: input, shape index: {}]   ;;  %s2024_s0 = inlined_call_operand.vmem [shape: bf16[128,32], index: 0, kind: input, shape index: {}]   ;;  %s2025_s2 = inlined_call_operand.vmem [shape: f32[8,16,8], index: 2, kind: output, shape index: {}]  }
   0x1   :  { %v1494_v0 = vld [vmem:[%s2023_s1 + $0x4] ss:$12 sps:$4 sm:$0xff]   ;;  %165 = vmatprep.mubr.bf16.mxu0 %v1574_v1  ;;  %v1496_v2 = vld [vmem:[%s2023_s1] ss:$12 sps:$4 sm:$0xff]   ;;  %v1497_v3 = vld [vmem:[%s2023_s1 + $0x1c] ss:$12 sps:$4 sm:$0xff]  }
   0x2   :  { %133 = vmatprep.subr.bf16.mxu0 %v1494_v0  ;;  %v1499_v4 = vld [vmem:[%s2023_s1 + $0x18] ss:$12 sps:$4 sm:$0xff]   ;;  %v1508_v6 = vld [vmem:[%s2023_s1 + $0x8] ss:$12 sps:$4 sm:$0xff]   ;;  %v1509_v7 = vld [vmem:[%s2023_s1 + $0x20] ss:$12 sps:$4 sm:$0xff]  }
   0x3   :  { %134 = vmatpush1.bf16.msra.mxu0 %v1496_v2  ;;  %v1500_v5 = vld [vmem:[%s2024_s0] sm:$0xff]   ;;  %1374 = vmatprep.subr.bf16.mxu1 %v1508_v6  ;;  %v1501_v8 = vld [vmem:[%s2024_s0 + $0x8] sm:$0xff]   ;;  %v1502_v9 = vld [vmem:[%s2024_s0 + $0x10] sm:$0xff]   ;;  %vm736_vm4 = vcmask 130048   ;;  %vm1273_vm5 = vcmask 64512  }
   0x4   :  { %135 = vmatprep.subr.bf16.mxu0 %v1497_v3  ;;  %1378 = vmatprep.mubr.msk.bf16.mxu1 %vm108_vm0, %v1500_v5  ;;  %v1503_v10 = vld [vmem:[%s2024_s0 + $0x18] sm:$0xff]   ;;  %v1504_v11 = vld [vmem:[%s2024_s0 + $0x20] sm:$0xff]   ;;  %v1505_v12 = vld [vmem:[%s2024_s0 + $0x28] sm:$0xff]  }
   0x5   :  { %1375 = vmatpush3.bf16.msra.mxu1 %v1508_v6  ;;  %v1506_v13 = vld [vmem:[%s2024_s0 + $0x30] sm:$0xff]   ;;  %v1507_v14 = vld [vmem:[%s2024_s0 + $0x38] sm:$0xff]  }
   0x6   :  { %1376 = vmatprep.subr.bf16.mxu1 %v1509_v7 }
   0x7   :  { %136 = vmatpush1.bf16.msra.mxu0 %v1499_v4 }
   0x8   :  { %1418 = vmatprep.subr.bf16.mxu0 %v1575_v15 }
   0x9   :  { %1377 = vmatpush3.bf16.msra.mxu1 %v1509_v7 }
   0xa   :  { %1308 = vmatmul.mubr.msk.bf16.vlgmr.msra.gmra.mrb[0].mxu0 %vm108_vm0, %v1500_v5  ;;  %1394 = vmatprep.subr.bf16.mxu1 %v1575_v15 }
   0xb   :  { %175 = vmatprep.mubr.bf16.mxu0 %v1574_v1 }
   0xc   :  { %1379 = vmatmul.mubr.msk.bf16.vlgmr.msra.gmra.mrb[0].mxu1 %vm108_vm0, %v1501_v8 }
   0xd   :  { %1382 = vmatprep.mubr.msk.bf16.mxu1 %vm108_vm0, %v1502_v9 }
  0x12   :  { %1309 = vmatmul.mubr.msk.bf16.gmra.mrb[4].mxu0 %vm108_vm0, %v1501_v8 }
  0x13   :  { %185 = vmatprep.mubr.bf16.mxu0 %v1574_v1 }
  0x14   :  { %1383 = vmatmul.mubr.msk.bf16.gmra.mrb[4].mxu1 %vm108_vm0, %v1503_v10 }
  0x15   :  { %1386 = vmatprep.mubr.msk.bf16.mxu1 %vm108_vm0, %v1504_v11 }
  0x1a   :  { %1310 = vmatmul.mubr.msk.bf16.gmra.mrb[8].mxu0 %vm108_vm0, %v1502_v9 }
  0x1b   :  { %195 = vmatprep.mubr.bf16.mxu0 %v1574_v1 }
  0x1c   :  { %1387 = vmatmul.mubr.msk.bf16.gmra.mrb[8].mxu1 %vm108_vm0, %v1505_v12 }
  0x1d   :  { %1390 = vmatprep.mubr.msk.bf16.mxu1 %vm108_vm0, %v1506_v13 }
  0x22   :  { %1311 = vmatmul.mubr.msk.bf16.gmra.mrb[12].mxu0 %vm108_vm0, %v1503_v10 }
  0x23   :  { %205 = vmatprep.mubr.bf16.mxu0 %v1574_v1 }
  0x24   :  { %1391 = vmatmul.mubr.msk.bf16.gmra.mrb[12].mxu1 %vm108_vm0, %v1507_v14 }
  0x25   :  { %1396 = vmatprep.mubr.msk.bf16.mxu1 %vm1576_vm1, %v1575_v15 }
  0x2a   :  { %1312 = vmatmul.mubr.msk.bf16.gmra.mrb[16].mxu0 %vm108_vm0, %v1504_v11 }
  0x2b   :  { %215 = vmatprep.mubr.bf16.mxu0 %v1574_v1 }
  0x32   :  { %1313 = vmatmul.mubr.msk.bf16.gmra.mrb[20].mxu0 %vm108_vm0, %v1505_v12 }
  0x33   :  { %225 = vmatprep.mubr.bf16.mxu0 %v1574_v1 }
  0x3a   :  { %1314 = vmatmul.mubr.msk.bf16.gmra.mrb[24].mxu0 %vm108_vm0, %v1506_v13 }
  0x3b   :  { %235 = vmatprep.mubr.bf16.mxu0 %v1574_v1 }
  0x42   :  { %1315 = vmatmul.mubr.msk.bf16.gmra.mrb[28].mxu0 %vm108_vm0, %v1507_v14 }
  0x43   :  { %1420 = vmatprep.mubr.msk.bf16.mxu0 %vm1576_vm1, %v1575_v15 }
  0xdd   :  { %v167_v16 = vpop.f32.mrb[0].mxu0 }
  0xde   :  { %v169_v17 = vpop.f32.mrb[1].mxu0 }
  0xdf   :  { %v171_v18 = vpop.f32.mrb[2].mxu0  ;;  %v1658_v27 = vpop.f32.mrb[0].mxu1 }
  0xe0   :  { %v343_v19 = vpack.c.bf16 %v171_v18, %v167_v16  ;;  %v173_v20 = vpop.f32.mrb[3].mxu0  ;;  %v1660_v29 = vpop.f32.mrb[1].mxu1 }
  0xe1   :  { %v351_v21 = vpack.c.bf16 %v173_v20, %v169_v17  ;;  %v1662_v30 = vpop.f32.mrb[2].mxu1 }
  0xe2   :  { %v360_v31 = vpack.c.bf16 %v1662_v30, %v1658_v27  ;;  %v1668_v32 = vpop.f32.mrb[3].mxu1 }
  0xe3   :  { %1395 = vmatpush3.bf16.xpose.msra.mxu1 %v351_v21  ;;  %v359_v33 = vpack.c.bf16 %v1668_v32, %v1660_v29 }
  0xe4   :  { %1400 = vmatprep.subr.bf16.mxu1 %v1575_v15 }
  0xe5   :  { %v177_v22 = vpop.f32.mrb[4].mxu0 }
  0xe6   :  { %v179_v23 = vpop.f32.mrb[5].mxu0 }
  0xe7   :  { %v181_v24 = vpop.f32.mrb[6].mxu0  ;;  %v1673_v39 = vpop.f32.mrb[4].mxu1 }
  0xe8   :  { %v344_v25 = vpack.c.bf16 %v181_v24, %v177_v22  ;;  %v183_v26 = vpop.f32.mrb[7].mxu0  ;;  %v1675_v41 = vpop.f32.mrb[5].mxu1 }
  0xe9   :  { %v352_v28 = vpack.c.bf16 %v183_v26, %v179_v23  ;;  %v1677_v42 = vpop.f32.mrb[6].mxu1 }
  0xea   :  { %1397 = vmatmul.mubr.bf16.vlgmr.msra.gmra.mrb[16].mxu1 %v343_v19  ;;  %v362_v43 = vpack.c.bf16 %v1677_v42, %v1673_v39  ;;  %v1683_v44 = vpop.f32.mrb[7].mxu1 }
  0xeb   :  { %1401 = vmatpush3.bf16.xpose.msra.mxu1 %v352_v28  ;;  %1402 = vmatprep.mubr.msk.bf16.mxu1 %vm1576_vm1, %v1575_v15  ;;  %v361_v45 = vpack.c.bf16 %v1683_v44, %v1675_v41 }
  0xec   :  { %1406 = vmatprep.subr.bf16.mxu1 %v1575_v15 }
  0xed   :  { %v187_v34 = vpop.f32.mrb[8].mxu0 }
  0xee   :  { %v189_v35 = vpop.f32.mrb[9].mxu0 }
  0xef   :  { %v191_v36 = vpop.f32.mrb[10].mxu0  ;;  %v1688_v51 = vpop.f32.mrb[8].mxu1 }
  0xf0   :  { %v345_v37 = vpack.c.bf16 %v191_v36, %v187_v34  ;;  %v193_v38 = vpop.f32.mrb[11].mxu0  ;;  %v1690_v53 = vpop.f32.mrb[9].mxu1 }
  0xf1   :  { %v353_v40 = vpack.c.bf16 %v193_v38, %v189_v35  ;;  %v1692_v54 = vpop.f32.mrb[10].mxu1 }
  0xf2   :  { %1403 = vmatmul.mubr.bf16.vlgmr.msra.gmra.mrb[20].mxu1 %v344_v25  ;;  %v364_v55 = vpack.c.bf16 %v1692_v54, %v1688_v51  ;;  %v1698_v56 = vpop.f32.mrb[11].mxu1  ;;  %v711_v25 = vlaneseq }
  0xf3   :  { %1407 = vmatpush3.bf16.xpose.msra.mxu1 %v353_v40  ;;  %1408 = vmatprep.mubr.msk.bf16.mxu1 %vm1576_vm1, %v1575_v15  ;;  %v363_v57 = vpack.c.bf16 %v1698_v56, %v1690_v53 }
  0xf4   :  { %1412 = vmatprep.subr.bf16.mxu1 %v1575_v15  ;;  %v712_v26 = vshrl.u32 %v711_v25, 7  ;;  %v715_v28 = vand.u32 127, %v711_v25 }
  0xf5   :  { %v197_v46 = vpop.f32.mrb[12].mxu0 }
  0xf6   :  { %v199_v47 = vpop.f32.mrb[13].mxu0  ;;  %v713_v29 = vadd.s32 8, %v712_v26  ;;  %vm716_vm2 = vcmp.ge.s32.totalorder %v712_v26, %v715_v28 }
  0xf7   :  { %v201_v48 = vpop.f32.mrb[14].mxu0  ;;  %v1703_v63 = vpop.f32.mrb[12].mxu1 }
  0xf8   :  { %v346_v49 = vpack.c.bf16 %v201_v48, %v197_v46  ;;  %v203_v50 = vpop.f32.mrb[15].mxu0  ;;  %v1705_v1 = vpop.f32.mrb[13].mxu1  ;;  %vm717_vm3 = vcmp.ge.s32.totalorder %v713_v29, %v715_v28 }
  0xf9   :  { %v354_v52 = vpack.c.bf16 %v203_v50, %v199_v47  ;;  %v1707_v2 = vpop.f32.mrb[14].mxu1 }
  0xfa   :  { %1409 = vmatmul.mubr.bf16.vlgmr.msra.gmra.mrb[24].mxu1 %v345_v37  ;;  %v366_v3 = vpack.c.bf16 %v1707_v2, %v1703_v63  ;;  %v1713_v4 = vpop.f32.mrb[15].mxu1 }
  0xfb   :  { %1413 = vmatpush3.bf16.xpose.msra.mxu1 %v354_v52  ;;  %1414 = vmatprep.mubr.msk.bf16.mxu1 %vm1576_vm1, %v1575_v15  ;;  %v365_v5 = vpack.c.bf16 %v1713_v4, %v1705_v1 }
  0xfc   :  { %1424 = vmatprep.subr.bf16.mxu1 %v1575_v15 }
  0xfd   :  { %v207_v58 = vpop.f32.mrb[16].mxu0 }
  0xfe   :  { %v209_v59 = vpop.f32.mrb[17].mxu0 }
  0xff   :  { %v211_v60 = vpop.f32.mrb[18].mxu0 }
 0x100   :  { %v347_v61 = vpack.c.bf16 %v211_v60, %v207_v58  ;;  %v213_v62 = vpop.f32.mrb[19].mxu0 }
 0x101   :  { %v355_v0 = vpack.c.bf16 %v213_v62, %v209_v59 }
 0x102   :  { %1415 = vmatmul.mubr.bf16.vlgmr.msra.gmra.mrb[28].mxu1 %v346_v49 }
 0x103   :  { %1419 = vmatpush3.bf16.xpose.msra.mxu0 %v355_v0  ;;  %1426 = vmatprep.mubr.msk.bf16.mxu1 %vm1576_vm1, %v1575_v15 }
 0x104   :  { %1430 = vmatprep.subr.bf16.mxu0 %v1575_v15 }
 0x105   :  { %v217_v6 = vpop.f32.mrb[20].mxu0 }
 0x106   :  { %v219_v7 = vpop.f32.mrb[21].mxu0 }
 0x107   :  { %v221_v8 = vpop.f32.mrb[22].mxu0 }
 0x108   :  { %v348_v9 = vpack.c.bf16 %v221_v8, %v217_v6  ;;  %v223_v10 = vpop.f32.mrb[23].mxu0 }
 0x109   :  { %v356_v11 = vpack.c.bf16 %v223_v10, %v219_v7 }
 0x10a   :  { %1421 = vmatmul.mubr.bf16.vlgmr.msra.gmra.mrb[32].mxu0 %v347_v61 }
 0x10b   :  { %1425 = vmatpush3.bf16.xpose.msra.mxu1 %v356_v11  ;;  %1432 = vmatprep.mubr.msk.bf16.mxu0 %vm1576_vm1, %v1575_v15 }
 0x10c   :  { %1436 = vmatprep.subr.bf16.mxu1 %v1575_v15 }
 0x10d   :  { %v227_v12 = vpop.f32.mrb[24].mxu0 }
 0x10e   :  { %v229_v13 = vpop.f32.mrb[25].mxu0 }
 0x10f   :  { %v231_v14 = vpop.f32.mrb[26].mxu0 }
 0x110   :  { %v349_v16 = vpack.c.bf16 %v231_v14, %v227_v12  ;;  %v233_v17 = vpop.f32.mrb[27].mxu0 }
 0x111   :  { %v357_v18 = vpack.c.bf16 %v233_v17, %v229_v13 }
 0x112   :  { %1427 = vmatmul.mubr.bf16.vlgmr.msra.gmra.mrb[32].mxu1 %v348_v9 }
 0x113   :  { %1431 = vmatpush3.bf16.xpose.msra.mxu0 %v357_v18  ;;  %1438 = vmatprep.mubr.msk.bf16.mxu1 %vm1576_vm1, %v1575_v15 }
 0x114   :  { %1442 = vmatprep.subr.bf16.mxu0 %v1575_v15 }
 0x115   :  { %v237_v19 = vpop.f32.mrb[28].mxu0 }
 0x116   :  { %v239_v20 = vpop.f32.mrb[29].mxu0 }
 0x117   :  { %v241_v21 = vpop.f32.mrb[30].mxu0 }
 0x118   :  { %v350_v22 = vpack.c.bf16 %v241_v21, %v237_v19  ;;  %v243_v23 = vpop.f32.mrb[31].mxu0 }
 0x119   :  { %v358_v24 = vpack.c.bf16 %v243_v23, %v239_v20 }
 0x11a   :  { %1433 = vmatmul.mubr.bf16.vlgmr.msra.gmra.mrb[36].mxu0 %v349_v16 }
 0x11b   :  { %1437 = vmatpush3.bf16.xpose.msra.mxu1 %v358_v24  ;;  %1443 = vmatpush3.bf16.msra.mxu0 %v359_v33  ;;  %v1577_v33 = vmov -1e+30  }
 0x11c   :  { %1448 = vmatprep.subr.bf16.mxu1 %v1575_v15  ;;  %1444 = vmatprep.mubr.msk.bf16.mxu0 %vm1576_vm1, %v1575_v15  ;;  %v1737_v34 = vsel %vm716_vm2, 0.0, %v1577_v33  ;;  %v1739_v27 = vsel %vm717_vm3, 0.0, %v1577_v33 }
 0x11d   :  { %1454 = vmatprep.subr.bf16.mxu0 %v1575_v15 }
 0x122   :  { %1439 = vmatmul.mubr.bf16.vlgmr.msra.gmra.mrb[36].mxu1 %v350_v22 }
 0x123   :  { %1449 = vmatpush3.bf16.msra.mxu1 %v360_v31  ;;  %1450 = vmatprep.mubr.msk.bf16.mxu1 %vm1576_vm1, %v1575_v15 }
 0x124   :  { %1460 = vmatprep.subr.bf16.mxu1 %v1575_v15 }
 0x1bd   :  { %v401_v32 = vpop.f32.mrb[16].mxu1 }
 0x1be   :  { %v695_v35 = vmul.f32 0.17677669, %v401_v32  ;;  %v1398_v36 = vpop.f32.mrb[17].mxu1 }
 0x1bf   :  { %v404_v37 = vpop.f32.mrb[18].mxu1 }
 0x1c0   :  { %v696_v30 = vmul.f32 0.17677669, %v404_v37  ;;  %v1399_v31 = vpop.f32.mrb[19].mxu1  ;;  %v1742_v38 = vadd.f32 %v1737_v34, %v695_v35 }
 0x1c2   :  { %v737_v40 = vsel %vm736_vm4, %v1742_v38, -inf  ;;  %v1747_v46 = vadd.f32 %v1739_v27, %v696_v30 }
 0x1c3   :  { %738 = vmax.xlane.f32.xlu0 %v737_v40 }
 0x1c4   :  { %v740_v50 = vsel %vm736_vm4, %v1747_v46, -inf }
 0x1c5   :  { %v442_v47 = vpop.f32.mrb[20].mxu1 }
 0x1c6   :  { %v697_v48 = vmul.f32 0.17677669, %v442_v47  ;;  %v1404_v49 = vpop.f32.mrb[21].mxu1 }
 0x1c7   :  { %741 = vmax.xlane.f32.xlu0 %v740_v50  ;;  %v445_v52 = vpop.f32.mrb[22].mxu1 }
 0x1c8   :  { %v698_v58 = vmul.f32 0.17677669, %v445_v52  ;;  %v1405_v59 = vpop.f32.mrb[23].mxu1  ;;  %v1752_v60 = vadd.f32 %v1737_v34, %v697_v48 }
 0x1ca   :  { %v743_v61 = vsel %vm736_vm4, %v1752_v60, -inf  ;;  %v1757_v62 = vadd.f32 %v1739_v27, %v698_v58 }
 0x1cb   :  { %744 = vmax.xlane.f32.xlu1 %v743_v61 }
 0x1cc   :  { %v746_v8 = vsel %vm736_vm4, %v1757_v62, -inf }
 0x1cd   :  { %v483_v0 = vpop.f32.mrb[24].mxu1 }
 0x1ce   :  { %v699_v6 = vmul.f32 0.17677669, %v483_v0  ;;  %v1410_v7 = vpop.f32.mrb[25].mxu1 }
 0x1cf   :  { %747 = vmax.xlane.f32.xlu1 %v746_v8  ;;  %v486_v9 = vpop.f32.mrb[26].mxu1 }
 0x1d0   :  { %v700_v10 = vmul.f32 0.17677669, %v486_v9  ;;  %v1411_v11 = vpop.f32.mrb[27].mxu1  ;;  %v1762_v12 = vadd.f32 %v1737_v34, %v699_v6 }
 0x1d2   :  { %v749_v13 = vsel %vm736_vm4, %v1762_v12, -inf  ;;  %v1767_v14 = vadd.f32 %v1739_v27, %v700_v10 }
 0x1d3   :  { %750 = vmax.xlane.f32.xlu0 %v749_v13 }
 0x1d4   :  { %v752_v16 = vsel %vm736_vm4, %v1767_v14, -inf }
 0x1d5   :  { %753 = vmax.xlane.f32.xlu1 %v752_v16  ;;  %v524_v17 = vpop.f32.mrb[28].mxu1 }
 0x1d6   :  { %v701_v18 = vmul.f32 0.17677669, %v524_v17  ;;  %v1416_v19 = vpop.f32.mrb[29].mxu1 }
 0x1d7   :  { %v527_v20 = vpop.f32.mrb[30].mxu1 }
 0x1d8   :  { %v702_v21 = vmul.f32 0.17677669, %v527_v20  ;;  %v1417_v22 = vpop.f32.mrb[31].mxu1  ;;  %v1772_v23 = vadd.f32 %v1737_v34, %v701_v18 }
 0x1da   :  { %v755_v24 = vsel %vm736_vm4, %v1772_v23, -inf  ;;  %v1777_v25 = vadd.f32 %v1739_v27, %v702_v21 }
 0x1db   :  { %756 = vmax.xlane.f32.xlu0 %v755_v24 }
 0x1dc   :  { %v758_v26 = vsel %vm736_vm4, %v1777_v25, -inf }
 0x1dd   :  { %759 = vmax.xlane.f32.xlu1 %v758_v26  ;;  %v565_v28 = vpop.f32.mrb[32].mxu0 }
 0x1de   :  { %v703_v29 = vmul.f32 0.17677669, %v565_v28  ;;  %v1422_v32 = vpop.f32.mrb[33].mxu0 }
 0x1df   :  { %v568_v33 = vpop.f32.mrb[34].mxu0 }
 0x1e0   :  { %v704_v35 = vmul.f32 0.17677669, %v568_v33  ;;  %v1423_v36 = vpop.f32.mrb[35].mxu0  ;;  %v1782_v37 = vadd.f32 %v1737_v34, %v703_v29 }
 0x1e2   :  { %v761_v30 = vsel %vm736_vm4, %v1782_v37, -inf  ;;  %v1787_v31 = vadd.f32 %v1739_v27, %v704_v35 }
 0x1e3   :  { %762 = vmax.xlane.f32.xlu0 %v761_v30 }
 0x1e4   :  { %v764_v40 = vsel %vm736_vm4, %v1787_v31, -inf }
 0x1e5   :  { %v606_v47 = vpop.f32.mrb[32].mxu1  ;;  %765 = vmax.xlane.f32.xlu1 %v764_v40 }
 0x1e6   :  { %v705_v48 = vmul.f32 0.17677669, %v606_v47  ;;  %v1428_v49 = vpop.f32.mrb[33].mxu1 }
 0x1e7   :  { %v609_v50 = vpop.f32.mrb[34].mxu1 }
 0x1e8   :  { %v706_v52 = vmul.f32 0.17677669, %v609_v50  ;;  %v1792_v58 = vadd.f32 %v1737_v34, %v705_v48  ;;  %v1429_v59 = vpop.f32.mrb[35].mxu1 }
 0x1ea   :  { %v767_v61 = vsel %vm736_vm4, %v1792_v58, -inf  ;;  %v1797_v0 = vadd.f32 %v1739_v27, %v706_v52 }
 0x1eb   :  { %768 = vmax.xlane.f32.xlu0 %v767_v61 }
 0x1ec   :  { %v770_v6 = vsel %vm736_vm4, %v1797_v0, -inf }
 0x1ed   :  { %771 = vmax.xlane.f32.xlu1 %v770_v6  ;;  %v647_v7 = vpop.f32.mrb[36].mxu0 }
 0x1ee   :  { %v707_v8 = vmul.f32 0.17677669, %v647_v7  ;;  %v1434_v9 = vpop.f32.mrb[37].mxu0 }
 0x1ef   :  { %v650_v10 = vpop.f32.mrb[38].mxu0 }
 0x1f0   :  { %v708_v11 = vmul.f32 0.17677669, %v650_v10  ;;  %v1802_v13 = vadd.f32 %v1737_v34, %v707_v8  ;;  %v1435_v16 = vpop.f32.mrb[39].mxu0 }
 0x1f2   :  { %v773_v17 = vsel %vm736_vm4, %v1802_v13, -inf  ;;  %v1807_v18 = vadd.f32 %v1739_v27, %v708_v11 }
 0x1f3   :  { %774 = vmax.xlane.f32.xlu0 %v773_v17 }
 0x1f4   :  { %v776_v19 = vsel %vm736_vm4, %v1807_v18, -inf }
 0x1f5   :  { %777 = vmax.xlane.f32.xlu1 %v776_v19  ;;  %v688_v20 = vpop.f32.mrb[36].mxu1 }
 0x1f6   :  { %v709_v21 = vmul.f32 0.17677669, %v688_v20  ;;  %v1440_v22 = vpop.f32.mrb[37].mxu1 }
 0x1f7   :  { %v691_v24 = vpop.f32.mrb[38].mxu1 }
 0x1f8   :  { %v710_v26 = vmul.f32 0.17677669, %v691_v24  ;;  %v1812_v28 = vadd.f32 %v1737_v34, %v709_v21  ;;  %v1441_v29 = vpop.f32.mrb[39].mxu1 }
 0x1fa   :  { %v779_v32 = vsel %vm736_vm4, %v1812_v28, -inf  ;;  %v1817_v33 = vadd.f32 %v1739_v27, %v710_v26 }
 0x1fb   :  { %780 = vmax.xlane.f32.xlu0 %v779_v32 }
 0x1fc   :  { %v782_v35 = vsel %vm736_vm4, %v1817_v33, -inf }
 0x1fd   :  { %783 = vmax.xlane.f32.xlu1 %v782_v35 }
 0x250   :  { %v739_v36 = vpop.xlane.xlu0 %738 }
 0x251   :  { %v785_v30 = vsub.f32 %v1742_v38, %v739_v36 }
 0x253   :  { %v801_v40 = vmul.f32 1.442695, %v785_v30 }
 0x254   :  { %v742_v47 = vpop.xlane.xlu0 %741 }
 0x255   :  { %1510 = vpow2.f32 %v801_v40  ;;  %v786_v34 = vsub.f32 %v1747_v46, %v742_v47 }
 0x257   :  { %v803_v48 = vmul.f32 1.442695, %v786_v34 }
 0x258   :  { %v745_v49 = vpop.xlane.xlu1 %744 }
 0x259   :  { %1512 = vpow2.f32 %v803_v48  ;;  %v787_v50 = vsub.f32 %v1752_v60, %v745_v49 }
 0x25b   :  { %v805_v27 = vmul.f32 1.442695, %v787_v50 }
 0x25c   :  { %v748_v52 = vpop.xlane.xlu1 %747 }
 0x25d   :  { %1514 = vpow2.f32 %v805_v27  ;;  %v788_v59 = vsub.f32 %v1757_v62, %v748_v52 }
 0x25f   :  { %v1825_v61 = vpop.eup %1510  ;;  %v807_v6 = vmul.f32 1.442695, %v788_v59 }
 0x260   :  { %v751_v7 = vpop.xlane.xlu0 %750  ;;  %v833_v38 = vsel %vm736_vm4, %v1825_v61, 0.0 }
 0x261   :  { %1516 = vpow2.f32 %v807_v6  ;;  %v789_v46 = vsub.f32 %v1762_v12, %v751_v7  ;;  %834 = vadd.xlane.f32.xlu0 %v833_v38 }
 0x262   :  { %v754_v8 = vpop.xlane.xlu1 %753 }
 0x263   :  { %v1830_v9 = vpop.eup %1512  ;;  %v809_v60 = vmul.f32 1.442695, %v789_v46  ;;  %v790_v10 = vsub.f32 %v1767_v14, %v754_v8 }
 0x264   :  { %v836_v62 = vsel %vm736_vm4, %v1830_v9, 0.0 }
 0x265   :  { %1518 = vpow2.f32 %v809_v60  ;;  %v811_v11 = vmul.f32 1.442695, %v790_v10  ;;  %837 = vadd.xlane.f32.xlu1 %v836_v62 }
 0x267   :  { %v1835_v16 = vpop.eup %1514  ;;  %1520 = vpow2.f32 %v811_v11 }
 0x268   :  { %v757_v17 = vpop.xlane.xlu0 %756  ;;  %v839_v12 = vsel %vm736_vm4, %v1835_v16, 0.0 }
 0x269   :  { %v791_v19 = vsub.f32 %v1772_v23, %v757_v17  ;;  %840 = vadd.xlane.f32.xlu0 %v839_v12 }
 0x26a   :  { %v760_v20 = vpop.xlane.xlu1 %759 }
 0x26b   :  { %v1840_v21 = vpop.eup %1516  ;;  %v813_v14 = vmul.f32 1.442695, %v791_v19  ;;  %v792_v22 = vsub.f32 %v1777_v25, %v760_v20 }
 0x26c   :  { %v842_v24 = vsel %vm736_vm4, %v1840_v21, 0.0 }
 0x26d   :  { %1522 = vpow2.f32 %v813_v14  ;;  %v815_v26 = vmul.f32 1.442695, %v792_v22  ;;  %843 = vadd.xlane.f32.xlu1 %v842_v24 }
 0x26f   :  { %v1845_v29 = vpop.eup %1518  ;;  %1524 = vpow2.f32 %v815_v26 }
 0x270   :  { %v763_v32 = vpop.xlane.xlu0 %762  ;;  %v845_v23 = vsel %vm736_vm4, %v1845_v29, 0.0 }
 0x271   :  { %v1849_v35 = vpop.eup %1520  ;;  %v793_v36 = vsub.f32 %v1782_v37, %v763_v32  ;;  %846 = vadd.xlane.f32.xlu0 %v845_v23 }
 0x272   :  { %v766_v30 = vpop.xlane.xlu1 %765  ;;  %v848_v25 = vsel %vm736_vm4, %v1849_v35, 0.0 }
 0x273   :  { %v817_v40 = vmul.f32 1.442695, %v793_v36  ;;  %v794_v47 = vsub.f32 %v1787_v31, %v766_v30  ;;  %849 = vadd.xlane.f32.xlu1 %v848_v25 }
 0x275   :  { %1526 = vpow2.f32 %v817_v40  ;;  %v819_v34 = vmul.f32 1.442695, %v794_v47 }
 0x277   :  { %v1855_v48 = vpop.eup %1522  ;;  %1528 = vpow2.f32 %v819_v34 }
 0x278   :  { %v769_v49 = vpop.xlane.xlu0 %768  ;;  %v851_v50 = vsel %vm736_vm4, %v1855_v48, 0.0 }
 0x279   :  { %v1859_v27 = vpop.eup %1524  ;;  %v795_v37 = vsub.f32 %v1792_v58, %v769_v49  ;;  %852 = vadd.xlane.f32.xlu0 %v851_v50 }
 0x27a   :  { %v772_v52 = vpop.xlane.xlu1 %771  ;;  %v854_v59 = vsel %vm736_vm4, %v1859_v27, 0.0 }
 0x27b   :  { %v821_v31 = vmul.f32 1.442695, %v795_v37  ;;  %v796_v6 = vsub.f32 %v1797_v0, %v772_v52  ;;  %855 = vadd.xlane.f32.xlu1 %v854_v59 }
 0x27d   :  { %1530 = vpow2.f32 %v821_v31  ;;  %v823_v7 = vmul.f32 1.442695, %v796_v6 }
 0x27f   :  { %v1865_v38 = vpop.eup %1526  ;;  %1532 = vpow2.f32 %v823_v7 }
 0x280   :  { %v775_v46 = vpop.xlane.xlu0 %774  ;;  %v857_v8 = vsel %vm736_vm4, %v1865_v38, 0.0 }
 0x281   :  { %v1869_v60 = vpop.eup %1528  ;;  %v797_v58 = vsub.f32 %v1802_v13, %v775_v46  ;;  %858 = vadd.xlane.f32.xlu0 %v857_v8 }
 0x282   :  { %v778_v10 = vpop.xlane.xlu1 %777  ;;  %v860_v62 = vsel %vm736_vm4, %v1869_v60, 0.0 }
 0x283   :  { %v825_v0 = vmul.f32 1.442695, %v797_v58  ;;  %v798_v11 = vsub.f32 %v1807_v18, %v778_v10  ;;  %861 = vadd.xlane.f32.xlu1 %v860_v62 }
 0x285   :  { %1534 = vpow2.f32 %v825_v0  ;;  %v827_v17 = vmul.f32 1.442695, %v798_v11 }
 0x287   :  { %v1875_v12 = vpop.eup %1530  ;;  %1536 = vpow2.f32 %v827_v17 }
 0x288   :  { %v781_v19 = vpop.xlane.xlu0 %780  ;;  %v863_v20 = vsel %vm736_vm4, %v1875_v12, 0.0 }
 0x289   :  { %v1879_v14 = vpop.eup %1532  ;;  %v799_v13 = vsub.f32 %v1812_v28, %v781_v19  ;;  %864 = vadd.xlane.f32.xlu0 %v863_v20 }
 0x28a   :  { %v784_v22 = vpop.xlane.xlu1 %783  ;;  %v866_v24 = vsel %vm736_vm4, %v1879_v14, 0.0 }
 0x28b   :  { %v829_v18 = vmul.f32 1.442695, %v799_v13  ;;  %v800_v26 = vsub.f32 %v1817_v33, %v784_v22  ;;  %867 = vadd.xlane.f32.xlu1 %v866_v24 }
 0x28d   :  { %1538 = vpow2.f32 %v829_v18  ;;  %v831_v32 = vmul.f32 1.442695, %v800_v26 }
 0x28f   :  { %v1885_v23 = vpop.eup %1534  ;;  %1540 = vpow2.f32 %v831_v32 }
 0x290   :  { %v869_v36 = vsel %vm736_vm4, %v1885_v23, 0.0 }
 0x291   :  { %v1889_v30 = vpop.eup %1536  ;;  %870 = vadd.xlane.f32.xlu0 %v869_v36 }
 0x292   :  { %v872_v28 = vsel %vm736_vm4, %v1889_v30, 0.0 }
 0x293   :  { %873 = vadd.xlane.f32.xlu1 %v872_v28 }
 0x297   :  { %v1893_v25 = vpop.eup %1538 }
 0x298   :  { %v875_v33 = vsel %vm736_vm4, %v1893_v25, 0.0 }
 0x299   :  { %v1897_v40 = vpop.eup %1540  ;;  %876 = vadd.xlane.f32.xlu0 %v875_v33 }
 0x29a   :  { %v878_v47 = vsel %vm736_vm4, %v1897_v40, 0.0 }
 0x29b   :  { %879 = vadd.xlane.f32.xlu1 %v878_v47 }
 0x2ee   :  { %v835_v34 = vpop.xlane.xlu0 %834 }
 0x2ef   :  { %1542 = vrcp.f32 %v835_v34 }
 0x2f2   :  { %v838_v49 = vpop.xlane.xlu1 %837 }
 0x2f3   :  { %1544 = vrcp.f32 %v838_v49 }
 0x2f6   :  { %v841_v50 = vpop.xlane.xlu0 %840 }
 0x2f7   :  { %1546 = vrcp.f32 %v841_v50 }
 0x2f9   :  { %v1543_v52 = vpop.eup %1542 }
 0x2fa   :  { %v844_v37 = vpop.xlane.xlu1 %843  ;;  %v897_v31 = vmul.f32 %v1543_v52, %v1825_v61 }
 0x2fb   :  { %1548 = vrcp.f32 %v844_v37 }
 0x2fd   :  { %v1545_v59 = vpop.eup %1544 }
 0x2fe   :  { %v898_v6 = vmul.f32 %v1545_v59, %v1830_v9  ;;  %v847_v7 = vpop.xlane.xlu0 %846 }
 0x2ff   :  { %1550 = vrcp.f32 %v847_v7 }
 0x300   :  { %v850_v46 = vpop.xlane.xlu1 %849  ;;  %v913_v8 = vpack.c.bf16 %v898_v6, %v897_v31 }
 0x301   :  { %1552 = vrcp.f32 %v850_v46  ;;  %v1547_v58 = vpop.eup %1546 }
 0x302   :  { %1445 = vmatmul.mubr.msk.bf16.vlgmr.msra.gmra.mrb[40].mxu0 %vm736_vm4, %v913_v8  ;;  %v899_v9 = vmul.f32 %v1547_v58, %v1835_v16 }
 0x303   :  { %1455 = vmatpush3.bf16.msra.mxu0 %v361_v45  ;;  %1456 = vmatprep.mubr.msk.bf16.mxu0 %vm1576_vm1, %v1575_v15 }
 0x304   :  { %1466 = vmatprep.subr.bf16.mxu0 %v1575_v15 }
 0x305   :  { %v1549_v61 = vpop.eup %1548 }
 0x306   :  { %v900_v10 = vmul.f32 %v1549_v61, %v1840_v21  ;;  %v853_v62 = vpop.xlane.xlu0 %852 }
 0x307   :  { %1554 = vrcp.f32 %v853_v62 }
 0x308   :  { %v856_v0 = vpop.xlane.xlu1 %855  ;;  %v914_v11 = vpack.c.bf16 %v900_v10, %v899_v9 }
 0x309   :  { %v1551_v17 = vpop.eup %1550  ;;  %1556 = vrcp.f32 %v856_v0 }
 0x30a   :  { %1451 = vmatmul.mubr.msk.bf16.vlgmr.msra.gmra.mrb[40].mxu1 %vm736_vm4, %v914_v11  ;;  %v901_v44 = vmul.f32 %v1551_v17, %v1845_v29 }
 0x30b   :  { %v1553_v41 = vpop.eup %1552  ;;  %1461 = vmatpush3.bf16.msra.mxu1 %v362_v43  ;;  %1462 = vmatprep.mubr.msk.bf16.mxu1 %vm1576_vm1, %v1575_v15 }
 0x30c   :  { %v902_v45 = vmul.f32 %v1553_v41, %v1849_v35  ;;  %1472 = vmatprep.subr.bf16.mxu1 %v1575_v15 }
 0x30e   :  { %v859_v16 = vpop.xlane.xlu0 %858  ;;  %v915_v21 = vpack.c.bf16 %v902_v45, %v901_v44 }
 0x30f   :  { %1558 = vrcp.f32 %v859_v16 }
 0x310   :  { %1457 = vmatmul.mubr.msk.bf16.vlgmr.msra.gmra.mrb[44].mxu0 %vm736_vm4, %v915_v21  ;;  %v862_v19 = vpop.xlane.xlu1 %861 }
 0x311   :  { %v1555_v20 = vpop.eup %1554  ;;  %1467 = vmatpush3.bf16.msra.mxu0 %v363_v57  ;;  %1560 = vrcp.f32 %v862_v19  ;;  %1468 = vmatprep.mubr.msk.bf16.mxu0 %vm1576_vm1, %v1575_v15 }
 0x312   :  { %1478 = vmatprep.subr.bf16.mxu0 %v1575_v15  ;;  %v903_v42 = vmul.f32 %v1555_v20, %v1855_v48 }
 0x313   :  { %v1557_v39 = vpop.eup %1556 }
 0x314   :  { %v904_v43 = vmul.f32 %v1557_v39, %v1859_v27 }
 0x316   :  { %v865_v29 = vpop.xlane.xlu0 %864  ;;  %v916_v35 = vpack.c.bf16 %v904_v43, %v903_v42 }
 0x317   :  { %1562 = vrcp.f32 %v865_v29 }
 0x318   :  { %1463 = vmatmul.mubr.msk.bf16.vlgmr.msra.gmra.mrb[44].mxu1 %vm736_vm4, %v916_v35  ;;  %v868_v13 = vpop.xlane.xlu1 %867 }
 0x319   :  { %v1559_v22 = vpop.eup %1558  ;;  %1473 = vmatpush3.bf16.msra.mxu1 %v364_v55  ;;  %1564 = vrcp.f32 %v868_v13  ;;  %1474 = vmatprep.mubr.msk.bf16.mxu1 %vm1576_vm1, %v1575_v15 }
 0x31a   :  { %1484 = vmatprep.subr.bf16.mxu1 %v1575_v15  ;;  %v905_v56 = vmul.f32 %v1559_v22, %v1865_v38 }
 0x31b   :  { %v1561_v53 = vpop.eup %1560 }
 0x31c   :  { %v906_v57 = vmul.f32 %v1561_v53, %v1869_v60 }
 0x31e   :  { %v871_v48 = vpop.xlane.xlu0 %870  ;;  %v917_v27 = vpack.c.bf16 %v906_v57, %v905_v56 }
 0x31f   :  { %1566 = vrcp.f32 %v871_v48 }
 0x320   :  { %1469 = vmatmul.mubr.msk.bf16.vlgmr.msra.gmra.mrb[48].mxu0 %vm736_vm4, %v917_v27  ;;  %v874_v24 = vpop.xlane.xlu1 %873 }
 0x321   :  { %v1563_v18 = vpop.eup %1562  ;;  %1479 = vmatpush3.bf16.msra.mxu0 %v365_v5  ;;  %1568 = vrcp.f32 %v874_v24  ;;  %1480 = vmatprep.mubr.msk.bf16.mxu0 %vm1576_vm1, %v1575_v15 }
 0x322   :  { %v907_v54 = vmul.f32 %v1563_v18, %v1875_v12 }
 0x323   :  { %v1565_v51 = vpop.eup %1564 }
 0x324   :  { %v908_v55 = vmul.f32 %v1565_v51, %v1879_v14 }
 0x326   :  { %v877_v38 = vpop.xlane.xlu0 %876  ;;  %v918_v60 = vpack.c.bf16 %v908_v55, %v907_v54 }
 0x327   :  { %1570 = vrcp.f32 %v877_v38 }
 0x328   :  { %1475 = vmatmul.mubr.msk.bf16.vlgmr.msra.gmra.mrb[48].mxu1 %vm736_vm4, %v918_v60  ;;  %v880_v26 = vpop.xlane.xlu1 %879 }
 0x329   :  { %v1567_v32 = vpop.eup %1566  ;;  %1485 = vmatpush3.bf16.msra.mxu1 %v366_v3  ;;  %1572 = vrcp.f32 %v880_v26  ;;  %1486 = vmatprep.mubr.msk.bf16.mxu1 %vm1576_vm1, %v1575_v15 }
 0x32a   :  { %v909_v4 = vmul.f32 %v1567_v32, %v1885_v23 }
 0x32b   :  { %v1569_v1 = vpop.eup %1568 }
 0x32c   :  { %v910_v5 = vmul.f32 %v1569_v1, %v1889_v30 }
 0x32e   :  { %v919_v12 = vpack.c.bf16 %v910_v5, %v909_v4 }
 0x330   :  { %1481 = vmatmul.mubr.msk.bf16.vlgmr.msra.gmra.mrb[52].mxu0 %vm736_vm4, %v919_v12 }
 0x331   :  { %v1571_v14 = vpop.eup %1570 }
 0x332   :  { %v911_v28 = vmul.f32 %v1571_v14, %v1893_v25 }
 0x333   :  { %v1573_v36 = vpop.eup %1572 }
 0x334   :  { %v912_v33 = vmul.f32 %v1573_v36, %v1897_v40 }
 0x336   :  { %v920_v63 = vpack.c.bf16 %v912_v33, %v911_v28 }
 0x338   :  { %1487 = vmatmul.mubr.msk.bf16.vlgmr.msra.gmra.mrb[52].mxu1 %vm736_vm4, %v920_v63 }
 0x3d5   :  { %v958_v2 = vpop.f32.mrb[40].mxu0 }
 0x3d6   :  { %1274 = vst.msk [vmem:[%s2025_s2] sm:$0xff] %vm1273_vm5, %v958_v2  ;;  %v1446_v15 = vpop.f32.mrb[41].mxu0 }
 0x3d7   :  { %v961_v3 = vpop.f32.mrb[42].mxu0 }
 0x3d8   :  { %1275 = vst.msk [vmem:[%s2025_s2 + $0x8] sm:$0xff] %vm1273_vm5, %v961_v3  ;;  %v1447_v23 = vpop.f32.mrb[43].mxu0 }
 0x3dd   :  { %v1002_v30 = vpop.f32.mrb[40].mxu1 }
 0x3de   :  { %1276 = vst.msk [vmem:[%s2025_s2 + $0x10] sm:$0xff] %vm1273_vm5, %v1002_v30  ;;  %v1452_v25 = vpop.f32.mrb[41].mxu1 }
 0x3df   :  { %v1005_v40 = vpop.f32.mrb[42].mxu1 }
 0x3e0   :  { %1277 = vst.msk [vmem:[%s2025_s2 + $0x18] sm:$0xff] %vm1273_vm5, %v1005_v40  ;;  %v1453_v47 = vpop.f32.mrb[43].mxu1 }
 0x3e3   :  { %v1046_v34 = vpop.f32.mrb[44].mxu0 }
 0x3e4   :  { %1278 = vst.msk [vmem:[%s2025_s2 + $0x20] sm:$0xff] %vm1273_vm5, %v1046_v34  ;;  %v1458_v49 = vpop.f32.mrb[45].mxu0 }
 0x3e5   :  { %v1049_v50 = vpop.f32.mrb[46].mxu0 }
 0x3e6   :  { %1279 = vst.msk [vmem:[%s2025_s2 + $0x28] sm:$0xff] %vm1273_vm5, %v1049_v50  ;;  %v1459_v37 = vpop.f32.mrb[47].mxu0 }
 0x3eb   :  { %v1090_v52 = vpop.f32.mrb[44].mxu1 }
 0x3ec   :  { %1280 = vst.msk [vmem:[%s2025_s2 + $0x30] sm:$0xff] %vm1273_vm5, %v1090_v52  ;;  %v1464_v59 = vpop.f32.mrb[45].mxu1 }
 0x3ed   :  { %v1093_v31 = vpop.f32.mrb[46].mxu1 }
 0x3ee   :  { %1281 = vst.msk [vmem:[%s2025_s2 + $0x38] sm:$0xff] %vm1273_vm5, %v1093_v31  ;;  %v1465_v6 = vpop.f32.mrb[47].mxu1 }
 0x3f3   :  { %v1134_v7 = vpop.f32.mrb[48].mxu0 }
 0x3f4   :  { %1282 = vst.msk [vmem:[%s2025_s2 + $0x40] sm:$0xff] %vm1273_vm5, %v1134_v7  ;;  %v1470_v46 = vpop.f32.mrb[49].mxu0 }
 0x3f5   :  { %v1137_v8 = vpop.f32.mrb[50].mxu0 }
 0x3f6   :  { %1283 = vst.msk [vmem:[%s2025_s2 + $0x48] sm:$0xff] %vm1273_vm5, %v1137_v8  ;;  %v1471_v58 = vpop.f32.mrb[51].mxu0 }
 0x3fb   :  { %v1178_v61 = vpop.f32.mrb[48].mxu1 }
 0x3fc   :  { %1284 = vst.msk [vmem:[%s2025_s2 + $0x50] sm:$0xff] %vm1273_vm5, %v1178_v61  ;;  %v1476_v9 = vpop.f32.mrb[49].mxu1 }
 0x3fd   :  { %v1181_v10 = vpop.f32.mrb[50].mxu1 }
 0x3fe   :  { %1285 = vst.msk [vmem:[%s2025_s2 + $0x58] sm:$0xff] %vm1273_vm5, %v1181_v10  ;;  %v1477_v62 = vpop.f32.mrb[51].mxu1 }
 0x403   :  { %v1222_v0 = vpop.f32.mrb[52].mxu0 }
 0x404   :  { %1286 = vst.msk [vmem:[%s2025_s2 + $0x60] sm:$0xff] %vm1273_vm5, %v1222_v0  ;;  %v1482_v11 = vpop.f32.mrb[53].mxu0 }
 0x405   :  { %v1225_v17 = vpop.f32.mrb[54].mxu0 }
 0x406   :  { %1287 = vst.msk [vmem:[%s2025_s2 + $0x68] sm:$0xff] %vm1273_vm5, %v1225_v17  ;;  %v1483_v41 = vpop.f32.mrb[55].mxu0 }
 0x40b   :  { %v1266_v44 = vpop.f32.mrb[52].mxu1 }
 0x40c   :  { %1288 = vst.msk [vmem:[%s2025_s2 + $0x70] sm:$0xff] %vm1273_vm5, %v1266_v44  ;;  %v1488_v45 = vpop.f32.mrb[53].mxu1 }
 0x40d   :  { %v1269_v16 = vpop.f32.mrb[54].mxu1 }
 0x40e   :  { %1289 = vst.msk [vmem:[%s2025_s2 + $0x78] sm:$0xff] %vm1273_vm5, %v1269_v16  ;;  %v1489_v21 = vpop.f32.mrb[55].mxu1 }

</bundles_post_ra>
